<compile_context>
chip_gen: v7x
topology: tpu7x:2x2x1
jax: 0.10.0
libtpu: 0.0.40
codegen_flags: <defaults>
</compile_context>

<pallas_src>
import functools

import jax
import jax.numpy as jnp
from jax import lax
from jax.experimental import pallas as pl
from jax.experimental.pallas import tpu as pltpu


def srnn_kernel(x2d_ref, w_inp_t_ref, w_rec_hi_ref, w_rec_lo_ref, w_out_t_ref,
                k_ref, vo_ref, xw_ref, z_ref, *, n_t, n_b_pad, alpha, thr):
    """SRNN forward.

    x2d_ref    : ((n_t-1)*n_b_pad, inp_pad)   input spikes, time-major, padded
    w_inp_t    : (inp_pad, n_rec_pad)          pre-transposed + zero-padded
    w_rec_hi/lo: (n_rec_pad, n_rec_pad) bf16   split-precision w_rec^T (diag=0)
    w_out_t    : (n_rec_pad, out_pad)          pre-transposed + zero-padded
    k_ref      : (n_t*n_b_pad, n_t*n_b_pad)    block-Toeplitz kappa-leak matrix
    vo_ref     : (n_t*n_b_pad, out_pad)        output membrane voltages (padded)
    xw_ref     : VMEM scratch ((n_t-1)*n_b_pad, n_rec_pad) — input projection
    z_ref      : VMEM scratch (n_t*n_b_pad, n_rec_pad)     — spike train
    """
    n_rec_pad = w_rec_hi_ref.shape[0]

    # (1) Batched input projection for timesteps 0 .. n_t-2 (one MXU matmul,
    #     lane/sublane-dense; the never-read last timestep was dropped).
    xw_ref[...] = jnp.dot(x2d_ref[...], w_inp_t_ref[...],
                          preferred_element_type=jnp.float32)

    # z[0] = 0 (init_CPU_states).  Aligned, unmasked 8x128 store.
    z_ref[pl.ds(0, n_b_pad), :] = jnp.zeros((n_b_pad, n_rec_pad), jnp.float32)

    # Hoist the (split-precision) recurrent weights out of the loop.
    w_hi = w_rec_hi_ref[...]
    w_lo = w_rec_lo_ref[...]

    # (2) Serial recurrence — the only part that cannot be parallelized over
    #     time.  z is exactly {0,1} (exact in bf16); w_rec^T = hi + lo with
    #     bf16 hi/lo, so two bf16 MXU passes with f32 accumulation reproduce
    #     the f32 matmul without multi-pass f32 emulation on the critical path.
    def step(t, carry):
        v, z = carry
        off = t * n_b_pad
        if not isinstance(t, int):
            off = pl.multiple_of(off, n_b_pad)
        xw_t = xw_ref[pl.ds(off, n_b_pad), :]                  # (n_b_pad, n_rec_pad)
        zb = z.astype(jnp.bfloat16)                            # exact cast of {0,1}
        rec = (jnp.dot(zb, w_hi, preferred_element_type=jnp.float32)
               + jnp.dot(zb, w_lo, preferred_element_type=jnp.float32))
        v_new = alpha * v + rec + xw_t - z * thr
        z_new = (v_new > thr).astype(jnp.float32)
        z_ref[pl.ds(off + n_b_pad, n_b_pad), :] = z_new        # aligned full-tile store
        return v_new, z_new

    carry = (jnp.zeros((n_b_pad, n_rec_pad), jnp.float32),
             jnp.zeros((n_b_pad, n_rec_pad), jnp.float32))
    if n_t - 1 <= 16:
        # Fully unrolled: every slice offset is a Python int -> static stores.
        for t in range(n_t - 1):
            carry = step(t, carry)
    else:
        carry = lax.fori_loop(0, n_t - 1, step, carry, unroll=8)

    # (3) Batched output projection + kappa-leak in one shot:
    #       vo[t] = sum_{1<=s<=t} kappa^(t-s) * (z[s] @ w_out^T)
    #     i.e. a lower-triangular block-Toeplitz matmul along time.  Single
    #     lane-dense slab store of the whole (padded) output; no second serial
    #     loop, no masked partial stores, vo[0] = 0 falls out of row 0 of K.
    y = jnp.dot(z_ref[...], w_out_t_ref[...], preferred_element_type=jnp.float32)
    vo_ref[...] = jnp.dot(k_ref[...], y, preferred_element_type=jnp.float32)


def _round_up(x, m):
    return ((x + m - 1) // m) * m


def _nbytes(shape, dtype):
    n = 1
    for d in shape:
        n *= int(d)
    return n * jnp.dtype(dtype).itemsize


@functools.partial(jax.jit, static_argnames=("alpha", "kappa", "thr", "b_o"))
def srnn_forward(x, w_inp, w_rec, w_out, *, alpha, kappa, thr, b_o=0.0):
    """Wrapper. x: (n_b, inp_dim, n_t) as in PyTorch. Returns vo: (n_t, n_b, out_dim)."""
    n_b, inp_dim, n_t = x.shape
    n_rec = w_rec.shape[0]
    out_dim = w_out.shape[0]

    assert thr > 0.0, "zero-padding relies on thr > 0 so padded units never spike"

    # (8,128)-aligned padded sizes.
    n_b_pad = _round_up(max(n_b, 1), 8)
    n_rec_pad = _round_up(n_rec, 128)
    inp_pad = _round_up(inp_dim, 128)
    out_pad = _round_up(out_dim, 128)

    # ---- layout plumbing in plain XLA (fused under jit) --------------------
    # Time-major, drop the never-read last timestep, pad, flatten to 2-D so
    # every in-kernel matmul is a plain 2-D MXU dot (no in-kernel reshapes).
    x_tbi = jnp.transpose(jnp.asarray(x, jnp.float32), (2, 0, 1))[: n_t - 1]
    x_tbi = jnp.pad(x_tbi, ((0, 0), (0, n_b_pad - n_b), (0, inp_pad - inp_dim)))
    x2d = x_tbi.reshape((n_t - 1) * n_b_pad, inp_pad)

    # reset_diagonal + transposes + padding done once in XLA.
    eye = jnp.eye(n_rec, dtype=jnp.float32)
    w_rec_t = (jnp.asarray(w_rec, jnp.float32) * (1.0 - eye)).T
    w_rec_t = jnp.pad(w_rec_t, ((0, n_rec_pad - n_rec), (0, n_rec_pad - n_rec)))
    # Split-precision planes for the serial recurrence matmul.
    w_rec_hi = w_rec_t.astype(jnp.bfloat16)
    w_rec_lo = (w_rec_t - w_rec_hi.astype(jnp.float32)).astype(jnp.bfloat16)

    w_inp_t = jnp.pad(jnp.asarray(w_inp, jnp.float32).T,
                      ((0, inp_pad - inp_dim), (0, n_rec_pad - n_rec)))
    w_out_t = jnp.pad(jnp.asarray(w_out, jnp.float32).T,
                      ((0, n_rec_pad - n_rec), (0, out_pad - out_dim)))

    # Lower-triangular kappa-power Toeplitz matrix over time, expanded to a
    # block form over the (padded) batch so the leak recurrence becomes a
    # single MXU matmul on the flattened (t, b) axis.
    tt = jnp.arange(n_t)
    diff = tt[:, None] - tt[None, :]                               # t - s
    t_mat = jnp.where((diff >= 0) & (tt[None, :] >= 1),
                      jnp.float32(kappa) ** jnp.maximum(diff, 0).astype(jnp.float32),
                      0.0)
    k_mat = (t_mat[:, None, :, None]
             * jnp.eye(n_b_pad, dtype=jnp.float32)[None, :, None, :])
    k_mat = k_mat.reshape(n_t * n_b_pad, n_t * n_b_pad)

    # ---- VMEM budget & cost estimate ----------------------------------------
    shapes = [
        (x2d.shape, jnp.float32), (w_inp_t.shape, jnp.float32),
        (w_rec_hi.shape, jnp.bfloat16), (w_rec_lo.shape, jnp.bfloat16),
        (w_out_t.shape, jnp.float32), (k_mat.shape, jnp.float32),
        ((n_t * n_b_pad, out_pad), jnp.float32),           # vo output
        (((n_t - 1) * n_b_pad, n_rec_pad), jnp.float32),   # xw scratch
        ((n_t * n_b_pad, n_rec_pad), jnp.float32),         # z scratch
    ]
    resident_bytes = sum(_nbytes(s, d) for s, d in shapes)
    try:
        vmem_cap = int(pltpu.get_tpu_info().vmem_capacity_bytes)
    except Exception:  # older jax / emulation — conservative (v7x) fallback
        vmem_cap = 64 << 20
    vmem_limit = min(int(0.9 * vmem_cap),
                     max(8 << 20, 2 * resident_bytes + (4 << 20)))

    flops = 2 * ((n_t - 1) * n_b_pad * inp_pad * n_rec_pad
                 + 2 * (n_t - 1) * n_b_pad * n_rec_pad * n_rec_pad
                 + n_t * n_b_pad * n_rec_pad * out_pad
                 + (n_t * n_b_pad) * (n_t * n_b_pad) * out_pad)
    cost = pl.CostEstimate(flops=int(flops), transcendentals=0,
                           bytes_accessed=int(resident_bytes))

    kernel = functools.partial(
        srnn_kernel, n_t=n_t, n_b_pad=n_b_pad,
        alpha=float(alpha), thr=float(thr))

    vmem_spec = pl.BlockSpec(memory_space=pltpu.MemorySpace.VMEM)
    vo2d = pl.pallas_call(
        kernel,
        out_shape=jax.ShapeDtypeStruct((n_t * n_b_pad, out_pad), jnp.float32),
        in_specs=[vmem_spec] * 6,
        out_specs=vmem_spec,
        scratch_shapes=[
            pltpu.VMEM(((n_t - 1) * n_b_pad, n_rec_pad), jnp.float32),  # xw
            pltpu.VMEM((n_t * n_b_pad, n_rec_pad), jnp.float32),        # z
        ],
        compiler_params=pltpu.CompilerParams(vmem_limit_bytes=vmem_limit),
        cost_estimate=cost,
    )(x2d, w_inp_t, w_rec_hi, w_rec_lo, w_out_t, k_mat)

    vo = vo2d.reshape(n_t, n_b_pad, out_pad)[:, :n_b, :out_dim]
    if b_o != 0.0:
        # vo[t] also accumulates b_o each step: b_o * sum_{s=1..t} kappa^(t-s).
        vo = vo + (b_o * t_mat.sum(axis=1))[:, None, None]
    return vo


def srnn_reference(x, w_inp, w_rec, w_out, *, alpha, kappa, thr, b_o=0.0):
    """Pure-JAX f32 reference matching the PyTorch forward loop."""
    n_b, inp_dim, n_t = x.shape
    n_rec = w_rec.shape[0]
    out_dim = w_out.shape[0]
    w_rec = w_rec * (1.0 - jnp.eye(n_rec, dtype=w_rec.dtype))
    v = jnp.zeros((n_b, n_rec), jnp.float32)
    z = jnp.zeros((n_b, n_rec), jnp.float32)
    vo = jnp.zeros((n_b, out_dim), jnp.float32)
    vos = [vo]
    for t in range(n_t - 1):
        v = alpha * v + z @ w_rec.T + x[:, :, t] @ w_inp.T - z * thr
        z = (v > thr).astype(jnp.float32)
        vo = kappa * vo + z @ w_out.T + b_o
        vos.append(vo)
    return jnp.stack(vos, axis=0)


def kaiming_normal(key, shape, gain):
    # torch.nn.init.kaiming_normal_ on a (fan_out, fan_in) matrix:
    # std = sqrt(2 / fan_in); then scaled by w_init_gain.
    fan_in = shape[1]
    std = (2.0 / fan_in) ** 0.5
    return gain * std * jax.random.normal(key, shape, dtype=jnp.float32)


if __name__ == "__main__":
    import numpy as np

    # Small shapes consistent with the module's forward.
    n_b, inp_dim, n_t = 2, 4, 8
    n_rec, out_dim = 32, 4

    # Hyperparameters (as the PyTorch __init__ would derive them).
    dt, tau_rec, tau_out = 1.0, 20.0, 20.0
    thr = 0.5
    w_init_gain = 0.5
    alpha = float(np.exp(-dt / tau_rec))
    kappa = float(np.exp(-dt / tau_out))
    b_o = 0.0

    key = jax.random.PRNGKey(0)
    k_x, k_inp, k_rec, k_out = jax.random.split(key, 4)

    # Input spike pattern: Bernoulli spikes in {0,1}, shape (n_b, inp_dim, n_t).
    x = (jax.random.uniform(k_x, (n_b, inp_dim, n_t)) < 0.5).astype(jnp.float32)

    # Deterministic kaiming-normal-style weight init (no xbar path).
    w_inp = kaiming_normal(k_inp, (n_rec, inp_dim), w_init_gain)
    w_rec = kaiming_normal(k_rec, (n_rec, n_rec), w_init_gain)
    w_out = kaiming_normal(k_out, (out_dim, n_rec), w_init_gain)

    vo = srnn_forward(x, w_inp, w_rec, w_out,
                      alpha=alpha, kappa=kappa, thr=thr, b_o=b_o)
    vo = jax.block_until_ready(vo)

    vo_ref = srnn_reference(x, w_inp, w_rec, w_out,
                            alpha=alpha, kappa=kappa, thr=thr, b_o=b_o)
    np.testing.assert_allclose(np.asarray(vo), np.asarray(vo_ref),
                               rtol=1e-4, atol=1e-4)

    # TODO(synk): XBar read/write paths, calc_traces / acc_gradient /
    # do_weight_update are training-time host logic, not part of forward();
    # only the forward pass is implemented here.
    print("KERNEL_OK")
</pallas_src>

<mosaic_0001>
module attributes {stable_mosaic.version = 11 : i64} {
  func.func @srnn_kernel(%arg0: memref<56x128xf32, #tpu.memory_space<vmem>>, %arg1: memref<128x128xf32, #tpu.memory_space<vmem>>, %arg2: memref<128x128xbf16, #tpu.memory_space<vmem>>, %arg3: memref<128x128xbf16, #tpu.memory_space<vmem>>, %arg4: memref<128x128xf32, #tpu.memory_space<vmem>>, %arg5: memref<64x64xf32, #tpu.memory_space<vmem>>, %arg6: memref<64x128xf32, #tpu.memory_space<vmem>>, %arg7: memref<56x128xf32, #tpu.memory_space<vmem>>, %arg8: memref<64x128xf32, #tpu.memory_space<vmem>>) attributes {dimension_semantics = [], scalar_prefetch = 0 : i64, scratch_operands = 2 : i64, tpu.core_type = #tpu.core_type<tc>} {
    %c0 = arith.constant 0 : index
    %c0_0 = arith.constant 0 : index
    %0 = vector.load %arg0[%c0, %c0_0] : memref<56x128xf32, #tpu.memory_space<vmem>>, vector<56x128xf32>
    %c0_1 = arith.constant 0 : index
    %c0_2 = arith.constant 0 : index
    %1 = vector.load %arg1[%c0_1, %c0_2] : memref<128x128xf32, #tpu.memory_space<vmem>>, vector<128x128xf32>
    %cst = arith.constant dense<0.000000e+00> : vector<56x128xf32>
    %2 = tpu.matmul %0, %1, %cst {dimension_numbers = #tpu.dot_dimension_numbers<[1], [0], [0], [1], [0, 0, 1, 1], [], []>} : vector<56x128xf32>, vector<128x128xf32>, vector<56x128xf32> -> vector<56x128xf32>
    %c0_3 = arith.constant 0 : index
    %c0_4 = arith.constant 0 : index
    %3 = vector.load %arg7[%c0_3, %c0_4] : memref<56x128xf32, #tpu.memory_space<vmem>>, vector<56x128xf32>
    tpu.vector_store %arg7[%c0_3, %c0_4], %2 {strides = array<i32>} : memref<56x128xf32, #tpu.memory_space<vmem>>, vector<56x128xf32>,
    %cst_5 = arith.constant 0.000000e+00 : f32
    %4 = vector.broadcast %cst_5 : f32 to vector<8x128xf32>
    %c0_6 = arith.constant 0 : index
    %c0_7 = arith.constant 0 : index
    %5 = vector.load %arg8[%c0_6, %c0_7] : memref<64x128xf32, #tpu.memory_space<vmem>>, vector<8x128xf32>
    tpu.vector_store %arg8[%c0_6, %c0_7], %4 {strides = array<i32>} : memref<64x128xf32, #tpu.memory_space<vmem>>, vector<8x128xf32>,
    %c0_8 = arith.constant 0 : index
    %c0_9 = arith.constant 0 : index
    %6 = vector.load %arg2[%c0_8, %c0_9] : memref<128x128xbf16, #tpu.memory_space<vmem>>, vector<128x128xbf16>
    %c0_10 = arith.constant 0 : index
    %c0_11 = arith.constant 0 : index
    %7 = vector.load %arg3[%c0_10, %c0_11] : memref<128x128xbf16, #tpu.memory_space<vmem>>, vector<128x128xbf16>
    %cst_12 = arith.constant 0.000000e+00 : f32
    %8 = vector.broadcast %cst_12 : f32 to vector<8x128xf32>
    %cst_13 = arith.constant 0.000000e+00 : f32
    %9 = vector.broadcast %cst_13 : f32 to vector<8x128xf32>
    %c0_14 = arith.constant 0 : index
    %c0_15 = arith.constant 0 : index
    %10 = vector.load %arg7[%c0_14, %c0_15] : memref<56x128xf32, #tpu.memory_space<vmem>>, vector<8x128xf32>
    %11 = arith.truncf %9 : vector<8x128xf32> to vector<8x128xbf16>
    %cst_16 = arith.constant dense<0.000000e+00> : vector<8x128xf32>
    %12 = tpu.matmul %11, %6, %cst_16 {dimension_numbers = #tpu.dot_dimension_numbers<[1], [0], [0], [1], [0, 0, 1, 1], [], []>} : vector<8x128xbf16>, vector<128x128xbf16>, vector<8x128xf32> -> vector<8x128xf32>
    %cst_17 = arith.constant dense<0.000000e+00> : vector<8x128xf32>
    %13 = tpu.matmul %11, %7, %cst_17 {dimension_numbers = #tpu.dot_dimension_numbers<[1], [0], [0], [1], [0, 0, 1, 1], [], []>} : vector<8x128xbf16>, vector<128x128xbf16>, vector<8x128xf32> -> vector<8x128xf32>
    %14 = arith.addf %12, %13 : vector<8x128xf32>
    %cst_18 = arith.constant 0.951229453 : f32
    %15 = vector.broadcast %cst_18 : f32 to vector<8x128xf32>
    %16 = arith.mulf %15, %8 : vector<8x128xf32>
    %17 = arith.addf %16, %14 : vector<8x128xf32>
    %18 = arith.addf %17, %10 : vector<8x128xf32>
    %cst_19 = arith.constant 5.000000e-01 : f32
    %19 = vector.broadcast %cst_19 : f32 to vector<8x128xf32>
    %20 = arith.mulf %9, %19 : vector<8x128xf32>
    %21 = arith.subf %18, %20 : vector<8x128xf32>
    %cst_20 = arith.constant 5.000000e-01 : f32
    %22 = vector.broadcast %cst_20 : f32 to vector<8x128xf32>
    %23 = arith.cmpf ogt, %21, %22 : vector<8x128xf32>
    %24 = arith.extui %23 : vector<8x128xi1> to vector<8x128xi32>
    %25 = arith.sitofp %24 : vector<8x128xi32> to vector<8x128xf32>
    %c8 = arith.constant 8 : index
    %c0_21 = arith.constant 0 : index
    %26 = vector.load %arg8[%c8, %c0_21] : memref<64x128xf32, #tpu.memory_space<vmem>>, vector<8x128xf32>
    tpu.vector_store %arg8[%c8, %c0_21], %25 {strides = array<i32>} : memref<64x128xf32, #tpu.memory_space<vmem>>, vector<8x128xf32>,
    %c8_22 = arith.constant 8 : index
    %c0_23 = arith.constant 0 : index
    %27 = vector.load %arg7[%c8_22, %c0_23] : memref<56x128xf32, #tpu.memory_space<vmem>>, vector<8x128xf32>
    %28 = arith.truncf %25 : vector<8x128xf32> to vector<8x128xbf16>
    %cst_24 = arith.constant dense<0.000000e+00> : vector<8x128xf32>
    %29 = tpu.matmul %28, %6, %cst_24 {dimension_numbers = #tpu.dot_dimension_numbers<[1], [0], [0], [1], [0, 0, 1, 1], [], []>} : vector<8x128xbf16>, vector<128x128xbf16>, vector<8x128xf32> -> vector<8x128xf32>
    %cst_25 = arith.constant dense<0.000000e+00> : vector<8x128xf32>
    %30 = tpu.matmul %28, %7, %cst_25 {dimension_numbers = #tpu.dot_dimension_numbers<[1], [0], [0], [1], [0, 0, 1, 1], [], []>} : vector<8x128xbf16>, vector<128x128xbf16>, vector<8x128xf32> -> vector<8x128xf32>
    %31 = arith.addf %29, %30 : vector<8x128xf32>
    %cst_26 = arith.constant 0.951229453 : f32
    %32 = vector.broadcast %cst_26 : f32 to vector<8x128xf32>
    %33 = arith.mulf %32, %21 : vector<8x128xf32>
    %34 = arith.addf %33, %31 : vector<8x128xf32>
    %35 = arith.addf %34, %27 : vector<8x128xf32>
    %cst_27 = arith.constant 5.000000e-01 : f32
    %36 = vector.broadcast %cst_27 : f32 to vector<8x128xf32>
    %37 = arith.mulf %25, %36 : vector<8x128xf32>
    %38 = arith.subf %35, %37 : vector<8x128xf32>
    %cst_28 = arith.constant 5.000000e-01 : f32
    %39 = vector.broadcast %cst_28 : f32 to vector<8x128xf32>
    %40 = arith.cmpf ogt, %38, %39 : vector<8x128xf32>
    %41 = arith.extui %40 : vector<8x128xi1> to vector<8x128xi32>
    %42 = arith.sitofp %41 : vector<8x128xi32> to vector<8x128xf32>
    %c16 = arith.constant 16 : index
    %c0_29 = arith.constant 0 : index
    %43 = vector.load %arg8[%c16, %c0_29] : memref<64x128xf32, #tpu.memory_space<vmem>>, vector<8x128xf32>
    tpu.vector_store %arg8[%c16, %c0_29], %42 {strides = array<i32>} : memref<64x128xf32, #tpu.memory_space<vmem>>, vector<8x128xf32>,
    %c16_30 = arith.constant 16 : index
    %c0_31 = arith.constant 0 : index
    %44 = vector.load %arg7[%c16_30, %c0_31] : memref<56x128xf32, #tpu.memory_space<vmem>>, vector<8x128xf32>
    %45 = arith.truncf %42 : vector<8x128xf32> to vector<8x128xbf16>
    %cst_32 = arith.constant dense<0.000000e+00> : vector<8x128xf32>
    %46 = tpu.matmul %45, %6, %cst_32 {dimension_numbers = #tpu.dot_dimension_numbers<[1], [0], [0], [1], [0, 0, 1, 1], [], []>} : vector<8x128xbf16>, vector<128x128xbf16>, vector<8x128xf32> -> vector<8x128xf32>
    %cst_33 = arith.constant dense<0.000000e+00> : vector<8x128xf32>
    %47 = tpu.matmul %45, %7, %cst_33 {dimension_numbers = #tpu.dot_dimension_numbers<[1], [0], [0], [1], [0, 0, 1, 1], [], []>} : vector<8x128xbf16>, vector<128x128xbf16>, vector<8x128xf32> -> vector<8x128xf32>
    %48 = arith.addf %46, %47 : vector<8x128xf32>
    %cst_34 = arith.constant 0.951229453 : f32
    %49 = vector.broadcast %cst_34 : f32 to vector<8x128xf32>
    %50 = arith.mulf %49, %38 : vector<8x128xf32>
    %51 = arith.addf %50, %48 : vector<8x128xf32>
    %52 = arith.addf %51, %44 : vector<8x128xf32>
    %cst_35 = arith.constant 5.000000e-01 : f32
    %53 = vector.broadcast %cst_35 : f32 to vector<8x128xf32>
    %54 = arith.mulf %42, %53 : vector<8x128xf32>
    %55 = arith.subf %52, %54 : vector<8x128xf32>
    %cst_36 = arith.constant 5.000000e-01 : f32
    %56 = vector.broadcast %cst_36 : f32 to vector<8x128xf32>
    %57 = arith.cmpf ogt, %55, %56 : vector<8x128xf32>
    %58 = arith.extui %57 : vector<8x128xi1> to vector<8x128xi32>
    %59 = arith.sitofp %58 : vector<8x128xi32> to vector<8x128xf32>
    %c24 = arith.constant 24 : index
    %c0_37 = arith.constant 0 : index
    %60 = vector.load %arg8[%c24, %c0_37] : memref<64x128xf32, #tpu.memory_space<vmem>>, vector<8x128xf32>
    tpu.vector_store %arg8[%c24, %c0_37], %59 {strides = array<i32>} : memref<64x128xf32, #tpu.memory_space<vmem>>, vector<8x128xf32>,
    %c24_38 = arith.constant 24 : index
    %c0_39 = arith.constant 0 : index
    %61 = vector.load %arg7[%c24_38, %c0_39] : memref<56x128xf32, #tpu.memory_space<vmem>>, vector<8x128xf32>
    %62 = arith.truncf %59 : vector<8x128xf32> to vector<8x128xbf16>
    %cst_40 = arith.constant dense<0.000000e+00> : vector<8x128xf32>
    %63 = tpu.matmul %62, %6, %cst_40 {dimension_numbers = #tpu.dot_dimension_numbers<[1], [0], [0], [1], [0, 0, 1, 1], [], []>} : vector<8x128xbf16>, vector<128x128xbf16>, vector<8x128xf32> -> vector<8x128xf32>
    %cst_41 = arith.constant dense<0.000000e+00> : vector<8x128xf32>
    %64 = tpu.matmul %62, %7, %cst_41 {dimension_numbers = #tpu.dot_dimension_numbers<[1], [0], [0], [1], [0, 0, 1, 1], [], []>} : vector<8x128xbf16>, vector<128x128xbf16>, vector<8x128xf32> -> vector<8x128xf32>
    %65 = arith.addf %63, %64 : vector<8x128xf32>
    %cst_42 = arith.constant 0.951229453 : f32
    %66 = vector.broadcast %cst_42 : f32 to vector<8x128xf32>
    %67 = arith.mulf %66, %55 : vector<8x128xf32>
    %68 = arith.addf %67, %65 : vector<8x128xf32>
    %69 = arith.addf %68, %61 : vector<8x128xf32>
    %cst_43 = arith.constant 5.000000e-01 : f32
    %70 = vector.broadcast %cst_43 : f32 to vector<8x128xf32>
    %71 = arith.mulf %59, %70 : vector<8x128xf32>
    %72 = arith.subf %69, %71 : vector<8x128xf32>
    %cst_44 = arith.constant 5.000000e-01 : f32
    %73 = vector.broadcast %cst_44 : f32 to vector<8x128xf32>
    %74 = arith.cmpf ogt, %72, %73 : vector<8x128xf32>
    %75 = arith.extui %74 : vector<8x128xi1> to vector<8x128xi32>
    %76 = arith.sitofp %75 : vector<8x128xi32> to vector<8x128xf32>
    %c32 = arith.constant 32 : index
    %c0_45 = arith.constant 0 : index
    %77 = vector.load %arg8[%c32, %c0_45] : memref<64x128xf32, #tpu.memory_space<vmem>>, vector<8x128xf32>
    tpu.vector_store %arg8[%c32, %c0_45], %76 {strides = array<i32>} : memref<64x128xf32, #tpu.memory_space<vmem>>, vector<8x128xf32>,
    %c32_46 = arith.constant 32 : index
    %c0_47 = arith.constant 0 : index
    %78 = vector.load %arg7[%c32_46, %c0_47] : memref<56x128xf32, #tpu.memory_space<vmem>>, vector<8x128xf32>
    %79 = arith.truncf %76 : vector<8x128xf32> to vector<8x128xbf16>
    %cst_48 = arith.constant dense<0.000000e+00> : vector<8x128xf32>
    %80 = tpu.matmul %79, %6, %cst_48 {dimension_numbers = #tpu.dot_dimension_numbers<[1], [0], [0], [1], [0, 0, 1, 1], [], []>} : vector<8x128xbf16>, vector<128x128xbf16>, vector<8x128xf32> -> vector<8x128xf32>
    %cst_49 = arith.constant dense<0.000000e+00> : vector<8x128xf32>
    %81 = tpu.matmul %79, %7, %cst_49 {dimension_numbers = #tpu.dot_dimension_numbers<[1], [0], [0], [1], [0, 0, 1, 1], [], []>} : vector<8x128xbf16>, vector<128x128xbf16>, vector<8x128xf32> -> vector<8x128xf32>
    %82 = arith.addf %80, %81 : vector<8x128xf32>
    %cst_50 = arith.constant 0.951229453 : f32
    %83 = vector.broadcast %cst_50 : f32 to vector<8x128xf32>
    %84 = arith.mulf %83, %72 : vector<8x128xf32>
    %85 = arith.addf %84, %82 : vector<8x128xf32>
    %86 = arith.addf %85, %78 : vector<8x128xf32>
    %cst_51 = arith.constant 5.000000e-01 : f32
    %87 = vector.broadcast %cst_51 : f32 to vector<8x128xf32>
    %88 = arith.mulf %76, %87 : vector<8x128xf32>
    %89 = arith.subf %86, %88 : vector<8x128xf32>
    %cst_52 = arith.constant 5.000000e-01 : f32
    %90 = vector.broadcast %cst_52 : f32 to vector<8x128xf32>
    %91 = arith.cmpf ogt, %89, %90 : vector<8x128xf32>
    %92 = arith.extui %91 : vector<8x128xi1> to vector<8x128xi32>
    %93 = arith.sitofp %92 : vector<8x128xi32> to vector<8x128xf32>
    %c40 = arith.constant 40 : index
    %c0_53 = arith.constant 0 : index
    %94 = vector.load %arg8[%c40, %c0_53] : memref<64x128xf32, #tpu.memory_space<vmem>>, vector<8x128xf32>
    tpu.vector_store %arg8[%c40, %c0_53], %93 {strides = array<i32>} : memref<64x128xf32, #tpu.memory_space<vmem>>, vector<8x128xf32>,
    %c40_54 = arith.constant 40 : index
    %c0_55 = arith.constant 0 : index
    %95 = vector.load %arg7[%c40_54, %c0_55] : memref<56x128xf32, #tpu.memory_space<vmem>>, vector<8x128xf32>
    %96 = arith.truncf %93 : vector<8x128xf32> to vector<8x128xbf16>
    %cst_56 = arith.constant dense<0.000000e+00> : vector<8x128xf32>
    %97 = tpu.matmul %96, %6, %cst_56 {dimension_numbers = #tpu.dot_dimension_numbers<[1], [0], [0], [1], [0, 0, 1, 1], [], []>} : vector<8x128xbf16>, vector<128x128xbf16>, vector<8x128xf32> -> vector<8x128xf32>
    %cst_57 = arith.constant dense<0.000000e+00> : vector<8x128xf32>
    %98 = tpu.matmul %96, %7, %cst_57 {dimension_numbers = #tpu.dot_dimension_numbers<[1], [0], [0], [1], [0, 0, 1, 1], [], []>} : vector<8x128xbf16>, vector<128x128xbf16>, vector<8x128xf32> -> vector<8x128xf32>
    %99 = arith.addf %97, %98 : vector<8x128xf32>
    %cst_58 = arith.constant 0.951229453 : f32
    %100 = vector.broadcast %cst_58 : f32 to vector<8x128xf32>
    %101 = arith.mulf %100, %89 : vector<8x128xf32>
    %102 = arith.addf %101, %99 : vector<8x128xf32>
    %103 = arith.addf %102, %95 : vector<8x128xf32>
    %cst_59 = arith.constant 5.000000e-01 : f32
    %104 = vector.broadcast %cst_59 : f32 to vector<8x128xf32>
    %105 = arith.mulf %93, %104 : vector<8x128xf32>
    %106 = arith.subf %103, %105 : vector<8x128xf32>
    %cst_60 = arith.constant 5.000000e-01 : f32
    %107 = vector.broadcast %cst_60 : f32 to vector<8x128xf32>
    %108 = arith.cmpf ogt, %106, %107 : vector<8x128xf32>
    %109 = arith.extui %108 : vector<8x128xi1> to vector<8x128xi32>
    %110 = arith.sitofp %109 : vector<8x128xi32> to vector<8x128xf32>
    %c48 = arith.constant 48 : index
    %c0_61 = arith.constant 0 : index
    %111 = vector.load %arg8[%c48, %c0_61] : memref<64x128xf32, #tpu.memory_space<vmem>>, vector<8x128xf32>
    tpu.vector_store %arg8[%c48, %c0_61], %110 {strides = array<i32>} : memref<64x128xf32, #tpu.memory_space<vmem>>, vector<8x128xf32>,
    %c48_62 = arith.constant 48 : index
    %c0_63 = arith.constant 0 : index
    %112 = vector.load %arg7[%c48_62, %c0_63] : memref<56x128xf32, #tpu.memory_space<vmem>>, vector<8x128xf32>
    %113 = arith.truncf %110 : vector<8x128xf32> to vector<8x128xbf16>
    %cst_64 = arith.constant dense<0.000000e+00> : vector<8x128xf32>
    %114 = tpu.matmul %113, %6, %cst_64 {dimension_numbers = #tpu.dot_dimension_numbers<[1], [0], [0], [1], [0, 0, 1, 1], [], []>} : vector<8x128xbf16>, vector<128x128xbf16>, vector<8x128xf32> -> vector<8x128xf32>
    %cst_65 = arith.constant dense<0.000000e+00> : vector<8x128xf32>
    %115 = tpu.matmul %113, %7, %cst_65 {dimension_numbers = #tpu.dot_dimension_numbers<[1], [0], [0], [1], [0, 0, 1, 1], [], []>} : vector<8x128xbf16>, vector<128x128xbf16>, vector<8x128xf32> -> vector<8x128xf32>
    %116 = arith.addf %114, %115 : vector<8x128xf32>
    %cst_66 = arith.constant 0.951229453 : f32
    %117 = vector.broadcast %cst_66 : f32 to vector<8x128xf32>
    %118 = arith.mulf %117, %106 : vector<8x128xf32>
    %119 = arith.addf %118, %116 : vector<8x128xf32>
    %120 = arith.addf %119, %112 : vector<8x128xf32>
    %cst_67 = arith.constant 5.000000e-01 : f32
    %121 = vector.broadcast %cst_67 : f32 to vector<8x128xf32>
    %122 = arith.mulf %110, %121 : vector<8x128xf32>
    %123 = arith.subf %120, %122 : vector<8x128xf32>
    %cst_68 = arith.constant 5.000000e-01 : f32
    %124 = vector.broadcast %cst_68 : f32 to vector<8x128xf32>
    %125 = arith.cmpf ogt, %123, %124 : vector<8x128xf32>
    %126 = arith.extui %125 : vector<8x128xi1> to vector<8x128xi32>
    %127 = arith.sitofp %126 : vector<8x128xi32> to vector<8x128xf32>
    %c56 = arith.constant 56 : index
    %c0_69 = arith.constant 0 : index
    %128 = vector.load %arg8[%c56, %c0_69] : memref<64x128xf32, #tpu.memory_space<vmem>>, vector<8x128xf32>
    tpu.vector_store %arg8[%c56, %c0_69], %127 {strides = array<i32>} : memref<64x128xf32, #tpu.memory_space<vmem>>, vector<8x128xf32>,
    %c0_70 = arith.constant 0 : index
    %c0_71 = arith.constant 0 : index
    %129 = vector.load %arg8[%c0_70, %c0_71] : memref<64x128xf32, #tpu.memory_space<vmem>>, vector<64x128xf32>
    %c0_72 = arith.constant 0 : index
    %c0_73 = arith.constant 0 : index
    %130 = vector.load %arg4[%c0_72, %c0_73] : memref<128x128xf32, #tpu.memory_space<vmem>>, vector<128x128xf32>
    %cst_74 = arith.constant dense<0.000000e+00> : vector<64x128xf32>
    %131 = tpu.matmul %129, %130, %cst_74 {dimension_numbers = #tpu.dot_dimension_numbers<[1], [0], [0], [1], [0, 0, 1, 1], [], []>} : vector<64x128xf32>, vector<128x128xf32>, vector<64x128xf32> -> vector<64x128xf32>
    %c0_75 = arith.constant 0 : index
    %c0_76 = arith.constant 0 : index
    %132 = vector.load %arg5[%c0_75, %c0_76] : memref<64x64xf32, #tpu.memory_space<vmem>>, vector<64x64xf32>
    %cst_77 = arith.constant dense<0.000000e+00> : vector<64x128xf32>
    %133 = tpu.matmul %132, %131, %cst_77 {dimension_numbers = #tpu.dot_dimension_numbers<[1], [0], [0], [1], [0, 0, 1, 1], [], []>} : vector<64x64xf32>, vector<64x128xf32>, vector<64x128xf32> -> vector<64x128xf32>
    %c0_78 = arith.constant 0 : index
    %c0_79 = arith.constant 0 : index
    %134 = vector.load %arg6[%c0_78, %c0_79] : memref<64x128xf32, #tpu.memory_space<vmem>>, vector<64x128xf32>
    tpu.vector_store %arg6[%c0_78, %c0_79], %133 {strides = array<i32>} : memref<64x128xf32, #tpu.memory_space<vmem>>, vector<64x128xf32>,
    return
  }
}

</mosaic_0001>

<bundles_post_ra>
// kernel: srnn_forward.1
= control target key start
LH: loop header
LB: loop body
LE: loop exit
PB: predicated region body
PF: predicated region fallthrough
CT: control target
= control target key end

     0   :  { %v1957_v0 = vmov 0.0   ;;  %v1958_v2 = vmov 0.0|0.0   ;;  %vm1959_vm0 = vmmov 0   ;;  %v1960_v34 = vmov 0   ;;  %s2629_s3 = inlined_call_operand.vmem [shape: bf16[128,128], index: 3, kind: input, shape index: {}]   ;;  %s2630_s1 = inlined_call_operand.vmem [shape: f32[128,128], index: 1, kind: input, shape index: {}]   ;;  %s2631_s2 = inlined_call_operand.vmem [shape: bf16[128,128], index: 2, kind: input, shape index: {}]   ;;  %s2632_s0 = inlined_call_operand.vmem [shape: f32[56,128], index: 0, kind: input, shape index: {}]   ;;  %s2633_s4 = inlined_call_operand.vmem [shape: f32[128,128], index: 4, kind: input, shape index: {}]   ;;  %s2634_s5 = inlined_call_operand.vmem [shape: f32[64,64], index: 5, kind: input, shape index: {}]   ;;  %s2635_s6 = inlined_call_operand.vmem [shape: f32[64,128], index: 6, kind: output, shape index: {}]  }
   0x1   :  { %1499 = vmatprep.subr.bf16.mxu1 %v1957_v0  ;;  %v2002_v1 = vld [vmem:[%s2629_s3] sm:$0xff]   ;;  %1851 = vmatprep.subr.bf16.mxu0 %v1958_v2  ;;  %v2013_v3 = vld [vmem:[%s2629_s3 + $0x8] sm:$0xff]   ;;  %v2020_v4 = vld [vmem:[%s2629_s3 + $0x10] sm:$0xff]   ;;  %vm1053_vm14 = vcmask 523264  }
   0x2   :  { %1515 = vmatprep.mubr.msk.bf16.mxu1 %vm1959_vm0, %v1957_v0  ;;  %1478 = vmatprep.mubr.msk.f32.mxu0 %vm1959_vm0, %v1957_v0  ;;  %v31_v5 = vld [vmem:[%s2630_s1] sm:$0xff]  ;;  %v32_v6 = vld [vmem:[%s2630_s1 + $0x8] sm:$0xff]  ;;  %v2032_v7 = vld [vmem:[%s2629_s3 + $0x18] sm:$0xff]  }
   0x3   :  { %1500 = vmatpush3.bf16.msra.mxu1 %v2002_v1  ;;  %v1852_v8 = vpack.c.bf16 %v32_v6, %v31_v5  ;;  %v33_v9 = vld [vmem:[%s2630_s1 + $0x10] sm:$0xff]  ;;  %v34_v10 = vld [vmem:[%s2630_s1 + $0x18] sm:$0xff]  ;;  %v35_v12 = vld [vmem:[%s2630_s1 + $0x20] sm:$0xff] }
   0x4   :  { %1501 = vmatprep.subr.bf16.mxu1 %v1957_v0  ;;  %v1855_v11 = vpack.c.bf16 %v34_v10, %v33_v9  ;;  %v36_v13 = vld [vmem:[%s2630_s1 + $0x28] sm:$0xff]  ;;  %v2053_v14 = vld [vmem:[%s2629_s3 + $0x20] sm:$0xff]   ;;  %v37_v16 = vld [vmem:[%s2630_s1 + $0x30] sm:$0xff]  ;;  %v1961_v9 = vmov 1.0|1.0  }
   0x5   :  { %1853 = vmatpush3.bf16.msra.mxu0 %v1852_v8  ;;  %v1858_v15 = vpack.c.bf16 %v36_v13, %v35_v12  ;;  %v38_v17 = vld [vmem:[%s2630_s1 + $0x38] sm:$0xff]  ;;  %v2067_v18 = vld [vmem:[%s2629_s3 + $0x28] sm:$0xff]   ;;  %v39_v20 = vld [vmem:[%s2630_s1 + $0x40] sm:$0xff] }
   0x6   :  { %1854 = vmatprep.subr.bf16.mxu0 %v1958_v2  ;;  %v1861_v19 = vpack.c.bf16 %v38_v17, %v37_v16  ;;  %v40_v21 = vld [vmem:[%s2630_s1 + $0x48] sm:$0xff]  ;;  %v2081_v22 = vld [vmem:[%s2629_s3 + $0x30] sm:$0xff]   ;;  %v42_v25 = vld [vmem:[%s2630_s1 + $0x58] sm:$0xff] }
   0x7   :  { %1502 = vmatpush3.bf16.msra.mxu1 %v2013_v3  ;;  %v1864_v23 = vpack.c.bf16 %v40_v21, %v39_v20  ;;  %v41_v24 = vld [vmem:[%s2630_s1 + $0x50] sm:$0xff]  ;;  %v2095_v26 = vld [vmem:[%s2629_s3 + $0x38] sm:$0xff]   ;;  %v43_v28 = vld [vmem:[%s2630_s1 + $0x60] sm:$0xff] }
   0x8   :  { %1503 = vmatprep.subr.bf16.mxu1 %v1957_v0  ;;  %v1867_v27 = vpack.c.bf16 %v42_v25, %v41_v24  ;;  %v44_v29 = vld [vmem:[%s2630_s1 + $0x68] sm:$0xff]  ;;  %v2109_v30 = vld [vmem:[%s2631_s2] sm:$0xff]   ;;  %v45_v32 = vld [vmem:[%s2630_s1 + $0x70] sm:$0xff] }
   0x9   :  { %1856 = vmatpush3.bf16.msra.mxu0 %v1855_v11  ;;  %v1870_v31 = vpack.c.bf16 %v44_v29, %v43_v28  ;;  %v46_v33 = vld [vmem:[%s2630_s1 + $0x78] sm:$0xff]  ;;  %v2123_v35 = vld [vmem:[%s2631_s2 + $0x8] sm:$0xff]   ;;  %v2133_v37 = vld [vmem:[%s2631_s2 + $0x10] sm:$0xff]  }
   0xa   :  { %1857 = vmatprep.subr.bf16.mxu0 %v1958_v2  ;;  %v1873_v36 = vpack.c.bf16 %v46_v33, %v45_v32  ;;  %v24_v38 = vld [vmem:[%s2632_s0] sm:$0xff]  ;;  %v2144_v39 = vld [vmem:[%s2631_s2 + $0x18] sm:$0xff]   ;;  %v25_v40 = vld [vmem:[%s2632_s0 + $0x8] sm:$0xff] }
   0xb   :  { %1504 = vmatpush3.bf16.msra.mxu1 %v2020_v4  ;;  %v2158_v41 = vld [vmem:[%s2631_s2 + $0x20] sm:$0xff]   ;;  %v26_v42 = vld [vmem:[%s2632_s0 + $0x10] sm:$0xff]  ;;  %v2172_v43 = vld [vmem:[%s2631_s2 + $0x28] sm:$0xff]  }
   0xc   :  { %1505 = vmatprep.subr.bf16.mxu1 %v1957_v0  ;;  %v27_v44 = vld [vmem:[%s2632_s0 + $0x18] sm:$0xff]  ;;  %v2186_v45 = vld [vmem:[%s2631_s2 + $0x30] sm:$0xff]   ;;  %v28_v46 = vld [vmem:[%s2632_s0 + $0x20] sm:$0xff] }
   0xd   :  { %1859 = vmatpush3.bf16.msra.mxu0 %v1858_v15  ;;  %v2200_v47 = vld [vmem:[%s2631_s2 + $0x38] sm:$0xff]   ;;  %v29_v48 = vld [vmem:[%s2632_s0 + $0x28] sm:$0xff]  ;;  %v30_v49 = vld [vmem:[%s2632_s0 + $0x30] sm:$0xff] }
   0xe   :  { %1860 = vmatprep.subr.bf16.mxu0 %v1958_v2 }
   0xf   :  { %1506 = vmatpush3.bf16.msra.mxu1 %v2032_v7 }
  0x10   :  { %1507 = vmatprep.subr.bf16.mxu1 %v1957_v0 }
  0x11   :  { %1862 = vmatpush3.bf16.msra.mxu0 %v1861_v19 }
  0x12   :  { %1863 = vmatprep.subr.bf16.mxu0 %v1958_v2 }
  0x13   :  { %1508 = vmatpush3.bf16.msra.mxu1 %v2053_v14 }
  0x14   :  { %1509 = vmatprep.subr.bf16.mxu1 %v1957_v0 }
  0x15   :  { %1865 = vmatpush3.bf16.msra.mxu0 %v1864_v23 }
  0x16   :  { %1866 = vmatprep.subr.bf16.mxu0 %v1958_v2 }
  0x17   :  { %1510 = vmatpush3.bf16.msra.mxu1 %v2067_v18 }
  0x18   :  { %1511 = vmatprep.subr.bf16.mxu1 %v1957_v0 }
  0x19   :  { %1868 = vmatpush3.bf16.msra.mxu0 %v1867_v27 }
  0x1a   :  { %1869 = vmatprep.subr.bf16.mxu0 %v1958_v2 }
  0x1b   :  { %1512 = vmatpush3.bf16.msra.mxu1 %v2081_v22 }
  0x1c   :  { %1513 = vmatprep.subr.bf16.mxu1 %v1957_v0 }
  0x1d   :  { %1871 = vmatpush3.bf16.msra.mxu0 %v1870_v31 }
  0x1e   :  { %1872 = vmatprep.subr.bf16.mxu0 %v1958_v2 }
  0x1f   :  { %1514 = vmatpush3.bf16.msra.mxu1 %v2095_v26 }
  0x20   :  { %1519 = vmatprep.subr.bf16.mxu1 %v1957_v0 }
  0x21   :  { %1874 = vmatpush3.bf16.msra.mxu0 %v1873_v36 }
  0x22   :  { %1516 = vmatmul.mubr.bf16.vlgmr.msra.gmra.mrb[0].mxu1 %v1960_v34  ;;  %1539 = vmatprep.subr.bf16.mxu0 %v1957_v0 }
  0x23   :  { %1520 = vmatpush3.bf16.msra.mxu1 %v2109_v30  ;;  %1535 = vmatprep.mubr.msk.bf16.mxu1 %vm1959_vm0, %v1957_v0 }
  0x24   :  { %1521 = vmatprep.subr.bf16.mxu1 %v1957_v0  ;;  %1479 = vmatmul.mubr.f32.vlgmr.msra.gmra.mrb[0].mxu0 %v24_v38 }
  0x25   :  { %1540 = vmatpush3.bf16.msra.mxu0 %v2002_v1  ;;  %1481 = vmatprep.mubr.msk.f32.mxu0 %vm1959_vm0, %v1957_v0 }
  0x26   :  { %1541 = vmatprep.subr.bf16.mxu0 %v1957_v0 }
  0x27   :  { %1522 = vmatpush3.bf16.msra.mxu1 %v2123_v35 }
  0x28   :  { %1523 = vmatprep.subr.bf16.mxu1 %v1957_v0  ;;  %1482 = vmatmul.mubr.f32.gmra.mrb[2].mxu0 %v25_v40 }
  0x29   :  { %1542 = vmatpush3.bf16.msra.mxu0 %v2013_v3  ;;  %1484 = vmatprep.mubr.msk.f32.mxu0 %vm1959_vm0, %v1957_v0 }
  0x2a   :  { %1543 = vmatprep.subr.bf16.mxu0 %v1957_v0 }
  0x2b   :  { %1524 = vmatpush3.bf16.msra.mxu1 %v2133_v37 }
  0x2c   :  { %1525 = vmatprep.subr.bf16.mxu1 %v1957_v0  ;;  %1485 = vmatmul.mubr.f32.gmra.mrb[4].mxu0 %v26_v42 }
  0x2d   :  { %1544 = vmatpush3.bf16.msra.mxu0 %v2020_v4  ;;  %1487 = vmatprep.mubr.msk.f32.mxu0 %vm1959_vm0, %v1957_v0 }
  0x2e   :  { %1545 = vmatprep.subr.bf16.mxu0 %v1957_v0 }
  0x2f   :  { %1526 = vmatpush3.bf16.msra.mxu1 %v2144_v39 }
  0x30   :  { %1527 = vmatprep.subr.bf16.mxu1 %v1957_v0  ;;  %1488 = vmatmul.mubr.f32.gmra.mrb[6].mxu0 %v27_v44 }
  0x31   :  { %1546 = vmatpush3.bf16.msra.mxu0 %v2032_v7  ;;  %1490 = vmatprep.mubr.msk.f32.mxu0 %vm1959_vm0, %v1957_v0 }
  0x32   :  { %1547 = vmatprep.subr.bf16.mxu0 %v1957_v0 }
  0x33   :  { %1528 = vmatpush3.bf16.msra.mxu1 %v2158_v41 }
  0x34   :  { %1529 = vmatprep.subr.bf16.mxu1 %v1957_v0  ;;  %1491 = vmatmul.mubr.f32.gmra.mrb[8].mxu0 %v28_v46 }
  0x35   :  { %1548 = vmatpush3.bf16.msra.mxu0 %v2053_v14  ;;  %1493 = vmatprep.mubr.msk.f32.mxu0 %vm1959_vm0, %v1957_v0 }
  0x36   :  { %1549 = vmatprep.subr.bf16.mxu0 %v1957_v0 }
  0x37   :  { %1530 = vmatpush3.bf16.msra.mxu1 %v2172_v43 }
  0x38   :  { %1531 = vmatprep.subr.bf16.mxu1 %v1957_v0  ;;  %1494 = vmatmul.mubr.f32.gmra.mrb[10].mxu0 %v29_v48 }
  0x39   :  { %1550 = vmatpush3.bf16.msra.mxu0 %v2067_v18  ;;  %1496 = vmatprep.mubr.msk.f32.mxu0 %vm1959_vm0, %v1957_v0 }
  0x3a   :  { %1551 = vmatprep.subr.bf16.mxu0 %v1957_v0 }
  0x3b   :  { %1532 = vmatpush3.bf16.msra.mxu1 %v2186_v45 }
  0x3c   :  { %1533 = vmatprep.subr.bf16.mxu1 %v1957_v0  ;;  %1497 = vmatmul.mubr.f32.gmra.mrb[12].mxu0 %v30_v49 }
  0x3d   :  { %1552 = vmatpush3.bf16.msra.mxu0 %v2081_v22  ;;  %1555 = vmatprep.mubr.msk.bf16.mxu0 %vm1959_vm0, %v1957_v0 }
  0x3e   :  { %1553 = vmatprep.subr.bf16.mxu0 %v1957_v0 }
  0x3f   :  { %1534 = vmatpush3.bf16.msra.mxu1 %v2200_v47 }
  0x40   :  { %1579 = vmatprep.subr.bf16.mxu1 %v1957_v0 }
  0x41   :  { %1554 = vmatpush3.bf16.msra.mxu0 %v2095_v26 }
  0x42   :  { %1536 = vmatmul.mubr.bf16.vlgmr.msra.gmra.mrb[0].mxu1 %v1960_v34  ;;  %1559 = vmatprep.subr.bf16.mxu0 %v1957_v0 }
  0x43   :  { %1580 = vmatpush3.bf16.msra.mxu1 %v2002_v1  ;;  %1595 = vmatprep.mubr.msk.bf16.mxu1 %vm1959_vm0, %v1957_v0 }
  0x44   :  { %1581 = vmatprep.subr.bf16.mxu1 %v1957_v0 }
  0x47   :  { %1582 = vmatpush3.bf16.msra.mxu1 %v2013_v3 }
  0x48   :  { %1583 = vmatprep.subr.bf16.mxu1 %v1957_v0 }
  0x4b   :  { %1584 = vmatpush3.bf16.msra.mxu1 %v2020_v4 }
  0x4c   :  { %1585 = vmatprep.subr.bf16.mxu1 %v1957_v0 }
  0x4f   :  { %1586 = vmatpush3.bf16.msra.mxu1 %v2032_v7 }
  0x50   :  { %1587 = vmatprep.subr.bf16.mxu1 %v1957_v0 }
  0x53   :  { %1588 = vmatpush3.bf16.msra.mxu1 %v2053_v14 }
  0x54   :  { %1589 = vmatprep.subr.bf16.mxu1 %v1957_v0 }
  0x57   :  { %1590 = vmatpush3.bf16.msra.mxu1 %v2067_v18 }
  0x58   :  { %1591 = vmatprep.subr.bf16.mxu1 %v1957_v0 }
  0x5b   :  { %1592 = vmatpush3.bf16.msra.mxu1 %v2081_v22 }
  0x5c   :  { %1593 = vmatprep.subr.bf16.mxu1 %v1957_v0 }
  0x5f   :  { %1594 = vmatpush3.bf16.msra.mxu1 %v2095_v26 }
  0x60   :  { %1619 = vmatprep.subr.bf16.mxu1 %v1957_v0 }
  0xf7   :  { %v113_v50 = vpop.f32.mrb[0].mxu0 }
  0xf8   :  { %v1480_v51 = vpop.f32.mrb[1].mxu0 }
  0xfb   :  { %v2243_v52 = vpop.f32.mrb[2].mxu0 }
  0xfc   :  { %v1483_v53 = vpop.f32.mrb[3].mxu0 }
  0xff   :  { %v2245_v54 = vpop.f32.mrb[4].mxu0 }
 0x100   :  { %v1486_v55 = vpop.f32.mrb[5].mxu0 }
 0x103   :  { %v2247_v56 = vpop.f32.mrb[6].mxu0 }
 0x104   :  { %v1489_v57 = vpop.f32.mrb[7].mxu0 }
 0x107   :  { %v2249_v58 = vpop.f32.mrb[8].mxu0 }
 0x108   :  { %v1492_v59 = vpop.f32.mrb[9].mxu0 }
 0x10b   :  { %v2251_v60 = vpop.f32.mrb[10].mxu0 }
 0x10c   :  { %v1495_v61 = vpop.f32.mrb[11].mxu0 }
 0x10f   :  { %v2301_v10 = vpop.f32.mrb[12].mxu0 }
 0x110   :  { %v1498_v11 = vpop.f32.mrb[13].mxu0 }
 0x115   :  { %v358_v62 = vpop.f32.mrb[0].mxu1 }
 0x116   :  { %v2253_v63 = vadd.f32 %v358_v62, %v113_v50  ;;  %v1537_v2 = vpop.f32.mrb[1].mxu1 }
 0x117   :  { %v361_v5 = vpop.f32.mrb[2].mxu1 }
 0x118   :  { %vm366_vm1 = vcmp.gt.f32.partialorder %v2253_v63, 0.5  ;;  %v1538_v6 = vpop.f32.mrb[3].mxu1  ;;  %v452_v19 = vmul.f32 0.95122945, %v2253_v63 }
 0x119   :  { %vm2259_vm2 = vmpackc.low %vm366_vm1, %vm366_vm1  ;;  %v1211_v23 = vsel %vm366_vm1, 1.0, %v1957_v0 }
 0x11a   :  { %1556 = vmatmul.mubr.msk.bf16.vlgmr.msra.gmra.mrb[16].mxu0 %vm2259_vm2, %v1961_v9  ;;  %v455_v28 = vmul.f32 0.5, %v1211_v23 }
 0x11b   :  { %1560 = vmatpush3.bf16.msra.mxu0 %v2109_v30  ;;  %1575 = vmatprep.mubr.msk.bf16.mxu0 %vm1959_vm0, %v1957_v0 }
 0x11c   :  { %1561 = vmatprep.subr.bf16.mxu0 %v1957_v0 }
 0x11f   :  { %1562 = vmatpush3.bf16.msra.mxu0 %v2123_v35 }
 0x120   :  { %1563 = vmatprep.subr.bf16.mxu0 %v1957_v0 }
 0x123   :  { %1564 = vmatpush3.bf16.msra.mxu0 %v2133_v37 }
 0x124   :  { %1565 = vmatprep.subr.bf16.mxu0 %v1957_v0 }
 0x127   :  { %1566 = vmatpush3.bf16.msra.mxu0 %v2144_v39 }
 0x128   :  { %1567 = vmatprep.subr.bf16.mxu0 %v1957_v0 }
 0x12b   :  { %1568 = vmatpush3.bf16.msra.mxu0 %v2158_v41 }
 0x12c   :  { %1569 = vmatprep.subr.bf16.mxu0 %v1957_v0 }
 0x12f   :  { %1570 = vmatpush3.bf16.msra.mxu0 %v2172_v43 }
 0x130   :  { %1571 = vmatprep.subr.bf16.mxu0 %v1957_v0 }
 0x133   :  { %1572 = vmatpush3.bf16.msra.mxu0 %v2186_v45 }
 0x134   :  { %1573 = vmatprep.subr.bf16.mxu0 %v1957_v0 }
 0x137   :  { %1574 = vmatpush3.bf16.msra.mxu0 %v2200_v47 }
 0x138   :  { %1599 = vmatprep.subr.bf16.mxu0 %v1957_v0 }
 0x13a   :  { %1576 = vmatmul.mubr.msk.bf16.vlgmr.msra.gmra.mrb[20].mxu0 %vm2259_vm2, %v1961_v9 }
 0x13b   :  { %1600 = vmatpush3.bf16.msra.mxu0 %v2109_v30  ;;  %1615 = vmatprep.mubr.msk.bf16.mxu0 %vm1959_vm0, %v1957_v0 }
 0x13c   :  { %1601 = vmatprep.subr.bf16.mxu0 %v1957_v0 }
 0x13f   :  { %1602 = vmatpush3.bf16.msra.mxu0 %v2123_v35 }
 0x140   :  { %1603 = vmatprep.subr.bf16.mxu0 %v1957_v0 }
 0x143   :  { %1604 = vmatpush3.bf16.msra.mxu0 %v2133_v37 }
 0x144   :  { %1605 = vmatprep.subr.bf16.mxu0 %v1957_v0 }
 0x147   :  { %1606 = vmatpush3.bf16.msra.mxu0 %v2144_v39 }
 0x148   :  { %1607 = vmatprep.subr.bf16.mxu0 %v1957_v0 }
 0x14b   :  { %1608 = vmatpush3.bf16.msra.mxu0 %v2158_v41 }
 0x14c   :  { %1609 = vmatprep.subr.bf16.mxu0 %v1957_v0 }
 0x14f   :  { %1610 = vmatpush3.bf16.msra.mxu0 %v2172_v43 }
 0x150   :  { %1611 = vmatprep.subr.bf16.mxu0 %v1957_v0 }
 0x153   :  { %1612 = vmatpush3.bf16.msra.mxu0 %v2186_v45 }
 0x154   :  { %1613 = vmatprep.subr.bf16.mxu0 %v1957_v0 }
 0x157   :  { %1614 = vmatpush3.bf16.msra.mxu0 %v2200_v47 }
 0x158   :  { %1639 = vmatprep.subr.bf16.mxu0 %v1957_v0 }
 0x1ed   :  { %v406_v12 = vpop.f32.mrb[16].mxu0 }
 0x1ee   :  { %v1557_v13 = vpop.f32.mrb[17].mxu0 }
 0x1ef   :  { %v409_v15 = vpop.f32.mrb[18].mxu0 }
 0x1f0   :  { %v1558_v16 = vpop.f32.mrb[19].mxu0 }
 0x20d   :  { %v446_v17 = vpop.f32.mrb[20].mxu0 }
 0x20e   :  { %v447_v20 = vadd.f32 %v446_v17, %v406_v12  ;;  %v1577_v21 = vpop.f32.mrb[21].mxu0 }
 0x20f   :  { %v449_v24 = vpop.f32.mrb[22].mxu0 }
 0x210   :  { %v453_v25 = vadd.f32 %v452_v19, %v447_v20  ;;  %v1578_v27 = vpop.f32.mrb[23].mxu0 }
 0x212   :  { %v454_v29 = vadd.f32 %v453_v25, %v2243_v52 }
 0x214   :  { %v2312_v31 = vsub.f32 %v454_v29, %v455_v28 }
 0x216   :  { %vm457_vm3 = vcmp.gt.f32.partialorder %v2312_v31, 0.5  ;;  %v543_v36 = vmul.f32 0.95122945, %v2312_v31 }
 0x217   :  { %vm1217_vm4 = vmpackc.low %vm457_vm3, %vm457_vm3  ;;  %v1216_v42 = vsel %vm457_vm3, 1.0, %v1957_v0 }
 0x218   :  { %1596 = vmatmul.mubr.msk.bf16.vlgmr.msra.gmra.mrb[4].mxu1 %vm1217_vm4, %v1961_v9  ;;  %1616 = vmatmul.mubr.msk.bf16.vlgmr.msra.gmra.mrb[24].mxu0 %vm1217_vm4, %v1961_v9  ;;  %v546_v52 = vmul.f32 0.5, %v1216_v42 }
 0x219   :  { %1620 = vmatpush3.bf16.msra.mxu1 %v2002_v1  ;;  %1640 = vmatpush3.bf16.msra.mxu0 %v2109_v30 }
 0x21a   :  { %1621 = vmatprep.subr.bf16.mxu1 %v1957_v0  ;;  %1641 = vmatprep.subr.bf16.mxu0 %v1957_v0 }
 0x21b   :  { %1635 = vmatprep.mubr.msk.bf16.mxu1 %vm1959_vm0, %v1957_v0  ;;  %1655 = vmatprep.mubr.msk.bf16.mxu0 %vm1959_vm0, %v1957_v0 }
 0x21d   :  { %1622 = vmatpush3.bf16.msra.mxu1 %v2013_v3  ;;  %1642 = vmatpush3.bf16.msra.mxu0 %v2123_v35 }
 0x21e   :  { %1623 = vmatprep.subr.bf16.mxu1 %v1957_v0  ;;  %1643 = vmatprep.subr.bf16.mxu0 %v1957_v0 }
 0x221   :  { %1624 = vmatpush3.bf16.msra.mxu1 %v2020_v4  ;;  %1644 = vmatpush3.bf16.msra.mxu0 %v2133_v37 }
 0x222   :  { %1625 = vmatprep.subr.bf16.mxu1 %v1957_v0  ;;  %1645 = vmatprep.subr.bf16.mxu0 %v1957_v0 }
 0x225   :  { %1626 = vmatpush3.bf16.msra.mxu1 %v2032_v7  ;;  %1646 = vmatpush3.bf16.msra.mxu0 %v2144_v39 }
 0x226   :  { %1627 = vmatprep.subr.bf16.mxu1 %v1957_v0  ;;  %1647 = vmatprep.subr.bf16.mxu0 %v1957_v0 }
 0x229   :  { %1628 = vmatpush3.bf16.msra.mxu1 %v2053_v14  ;;  %1648 = vmatpush3.bf16.msra.mxu0 %v2158_v41 }
 0x22a   :  { %1629 = vmatprep.subr.bf16.mxu1 %v1957_v0  ;;  %1649 = vmatprep.subr.bf16.mxu0 %v1957_v0 }
 0x22d   :  { %1630 = vmatpush3.bf16.msra.mxu1 %v2067_v18  ;;  %1650 = vmatpush3.bf16.msra.mxu0 %v2172_v43 }
 0x22e   :  { %1631 = vmatprep.subr.bf16.mxu1 %v1957_v0  ;;  %1651 = vmatprep.subr.bf16.mxu0 %v1957_v0 }
 0x231   :  { %1632 = vmatpush3.bf16.msra.mxu1 %v2081_v22  ;;  %1652 = vmatpush3.bf16.msra.mxu0 %v2186_v45 }
 0x232   :  { %1633 = vmatprep.subr.bf16.mxu1 %v1957_v0  ;;  %1653 = vmatprep.subr.bf16.mxu0 %v1957_v0 }
 0x235   :  { %1634 = vmatpush3.bf16.msra.mxu1 %v2095_v26  ;;  %1654 = vmatpush3.bf16.msra.mxu0 %v2200_v47 }
 0x236   :  { %1659 = vmatprep.subr.bf16.mxu1 %v1957_v0  ;;  %1679 = vmatprep.subr.bf16.mxu0 %v1957_v0 }
 0x2eb   :  { %v497_v32 = vpop.f32.mrb[4].mxu1  ;;  %v537_v33 = vpop.f32.mrb[24].mxu0 }
 0x2ec   :  { %v538_v34 = vadd.f32 %v537_v33, %v497_v32  ;;  %v1597_v38 = vpop.f32.mrb[5].mxu1  ;;  %v1617_v40 = vpop.f32.mrb[25].mxu0 }
 0x2ed   :  { %v500_v44 = vpop.f32.mrb[6].mxu1  ;;  %v540_v46 = vpop.f32.mrb[26].mxu0  ;;  %v926_v38 = vld [vmem:[%s2633_s4 + $0x10] sm:$0xff]  ;;  %v927_v40 = vld [vmem:[%s2633_s4 + $0x18] sm:$0xff] }
 0x2ee   :  { %v544_v48 = vadd.f32 %v543_v36, %v538_v34  ;;  %v1598_v49 = vpop.f32.mrb[7].mxu1  ;;  %v1618_v50 = vpop.f32.mrb[27].mxu0  ;;  %v1879_v44 = vpack.c.bf16 %v927_v40, %v926_v38  ;;  %v928_v46 = vld [vmem:[%s2633_s4 + $0x20] sm:$0xff] }
 0x2ef   :  { %v930_v49 = vld [vmem:[%s2633_s4 + $0x30] sm:$0xff]  ;;  %v931_v50 = vld [vmem:[%s2633_s4 + $0x38] sm:$0xff] }
 0x2f0   :  { %v545_v51 = vadd.f32 %v544_v48, %v2245_v54 }
 0x2f2   :  { %v2361_v53 = vsub.f32 %v545_v51, %v546_v52  ;;  %v1887_v51 = vpack.c.bf16 %v931_v50, %v930_v49  ;;  %v933_v52 = vld [vmem:[%s2633_s4 + $0x48] sm:$0xff] }
 0x2f4   :  { %vm548_vm5 = vcmp.gt.f32.partialorder %v2361_v53, 0.5  ;;  %v634_v59 = vmul.f32 0.95122945, %v2361_v53 }
 0x2f5   :  { %vm1222_vm6 = vmpackc.low %vm548_vm5, %vm548_vm5  ;;  %v1221_v2 = vsel %vm548_vm5, 1.0, %v1957_v0 }
 0x2f6   :  { %1636 = vmatmul.mubr.msk.bf16.vlgmr.msra.gmra.mrb[8].mxu1 %vm1222_vm6, %v1961_v9  ;;  %1656 = vmatmul.mubr.msk.bf16.vlgmr.msra.gmra.mrb[28].mxu0 %vm1222_vm6, %v1961_v9  ;;  %v637_v15 = vmul.f32 0.5, %v1221_v2 }
 0x2f7   :  { %1660 = vmatpush3.bf16.msra.mxu1 %v2002_v1  ;;  %1680 = vmatpush3.bf16.msra.mxu0 %v2109_v30 }
 0x2f8   :  { %1661 = vmatprep.subr.bf16.mxu1 %v1957_v0  ;;  %1681 = vmatprep.subr.bf16.mxu0 %v1957_v0 }
 0x2f9   :  { %1675 = vmatprep.mubr.msk.bf16.mxu1 %vm1959_vm0, %v1957_v0  ;;  %1695 = vmatprep.mubr.msk.bf16.mxu0 %vm1959_vm0, %v1957_v0 }
 0x2fb   :  { %1662 = vmatpush3.bf16.msra.mxu1 %v2013_v3  ;;  %1682 = vmatpush3.bf16.msra.mxu0 %v2123_v35 }
 0x2fc   :  { %1663 = vmatprep.subr.bf16.mxu1 %v1957_v0  ;;  %1683 = vmatprep.subr.bf16.mxu0 %v1957_v0 }
 0x2ff   :  { %1664 = vmatpush3.bf16.msra.mxu1 %v2020_v4  ;;  %1684 = vmatpush3.bf16.msra.mxu0 %v2133_v37 }
 0x300   :  { %1665 = vmatprep.subr.bf16.mxu1 %v1957_v0  ;;  %1685 = vmatprep.subr.bf16.mxu0 %v1957_v0 }
 0x303   :  { %1666 = vmatpush3.bf16.msra.mxu1 %v2032_v7  ;;  %1686 = vmatpush3.bf16.msra.mxu0 %v2144_v39 }
 0x304   :  { %1667 = vmatprep.subr.bf16.mxu1 %v1957_v0  ;;  %1687 = vmatprep.subr.bf16.mxu0 %v1957_v0 }
 0x307   :  { %1668 = vmatpush3.bf16.msra.mxu1 %v2053_v14  ;;  %1688 = vmatpush3.bf16.msra.mxu0 %v2158_v41 }
 0x308   :  { %1669 = vmatprep.subr.bf16.mxu1 %v1957_v0  ;;  %1689 = vmatprep.subr.bf16.mxu0 %v1957_v0 }
 0x30b   :  { %1670 = vmatpush3.bf16.msra.mxu1 %v2067_v18  ;;  %1690 = vmatpush3.bf16.msra.mxu0 %v2172_v43 }
 0x30c   :  { %1671 = vmatprep.subr.bf16.mxu1 %v1957_v0  ;;  %1691 = vmatprep.subr.bf16.mxu0 %v1957_v0 }
 0x30f   :  { %1672 = vmatpush3.bf16.msra.mxu1 %v2081_v22  ;;  %1692 = vmatpush3.bf16.msra.mxu0 %v2186_v45 }
 0x310   :  { %1673 = vmatprep.subr.bf16.mxu1 %v1957_v0  ;;  %1693 = vmatprep.subr.bf16.mxu0 %v1957_v0 }
 0x313   :  { %1674 = vmatpush3.bf16.msra.mxu1 %v2095_v26  ;;  %1694 = vmatpush3.bf16.msra.mxu0 %v2200_v47 }
 0x314   :  { %1699 = vmatprep.subr.bf16.mxu1 %v1957_v0  ;;  %1719 = vmatprep.subr.bf16.mxu0 %v1957_v0 }
 0x3c9   :  { %v588_v54 = vpop.f32.mrb[8].mxu1  ;;  %v628_v55 = vpop.f32.mrb[28].mxu0 }
 0x3ca   :  { %v629_v57 = vadd.f32 %v628_v55, %v588_v54  ;;  %v1637_v61 = vpop.f32.mrb[9].mxu1  ;;  %v1657_v62 = vpop.f32.mrb[29].mxu0  ;;  %v934_v55 = vld [vmem:[%s2633_s4 + $0x50] sm:$0xff] }
 0x3cb   :  { %v591_v5 = vpop.f32.mrb[10].mxu1  ;;  %v631_v6 = vpop.f32.mrb[30].mxu0  ;;  %v936_v61 = vld [vmem:[%s2633_s4 + $0x60] sm:$0xff]  ;;  %v937_v62 = vld [vmem:[%s2633_s4 + $0x68] sm:$0xff] }
 0x3cc   :  { %v635_v8 = vadd.f32 %v634_v59, %v629_v57  ;;  %v1638_v11 = vpop.f32.mrb[11].mxu1  ;;  %v1658_v12 = vpop.f32.mrb[31].mxu0  ;;  %v935_v57 = vld [vmem:[%s2633_s4 + $0x58] sm:$0xff]  ;;  %v1899_v2 = vpack.c.bf16 %v937_v62, %v936_v61  ;;  %v938_v5 = vld [vmem:[%s2633_s4 + $0x70] sm:$0xff] }
 0x3cd   :  { %v1895_v59 = vpack.c.bf16 %v935_v57, %v934_v55  ;;  %v939_v6 = vld [vmem:[%s2633_s4 + $0x78] sm:$0xff]  ;;  %v1962_v11 = vmov 1.0  }
 0x3ce   :  { %v636_v13 = vadd.f32 %v635_v8, %v2247_v56  ;;  %v1903_v8 = vpack.c.bf16 %v939_v6, %v938_v5 }
 0x3d0   :  { %v2410_v16 = vsub.f32 %v636_v13, %v637_v15 }
 0x3d2   :  { %vm639_vm7 = vcmp.gt.f32.partialorder %v2410_v16, 0.5  ;;  %v725_v20 = vmul.f32 0.95122945, %v2410_v16 }
 0x3d3   :  { %vm1227_vm8 = vmpackc.low %vm639_vm7, %vm639_vm7  ;;  %v1226_v24 = vsel %vm639_vm7, 1.0, %v1957_v0 }
 0x3d4   :  { %1676 = vmatmul.mubr.msk.bf16.vlgmr.msra.gmra.mrb[12].mxu1 %vm1227_vm8, %v1961_v9  ;;  %1696 = vmatmul.mubr.msk.bf16.vlgmr.msra.gmra.mrb[32].mxu0 %vm1227_vm8, %v1961_v9  ;;  %v728_v34 = vmul.f32 0.5, %v1226_v24 }
 0x3d5   :  { %1700 = vmatpush3.bf16.msra.mxu1 %v2002_v1  ;;  %1720 = vmatpush3.bf16.msra.mxu0 %v2109_v30 }
 0x3d6   :  { %1701 = vmatprep.subr.bf16.mxu1 %v1957_v0  ;;  %1721 = vmatprep.subr.bf16.mxu0 %v1957_v0 }
 0x3d7   :  { %1715 = vmatprep.mubr.msk.bf16.mxu1 %vm1959_vm0, %v1957_v0  ;;  %1735 = vmatprep.mubr.msk.bf16.mxu0 %vm1959_vm0, %v1957_v0 }
 0x3d9   :  { %1702 = vmatpush3.bf16.msra.mxu1 %v2013_v3  ;;  %1722 = vmatpush3.bf16.msra.mxu0 %v2123_v35 }
 0x3da   :  { %1703 = vmatprep.subr.bf16.mxu1 %v1957_v0  ;;  %1723 = vmatprep.subr.bf16.mxu0 %v1957_v0 }
 0x3dd   :  { %1704 = vmatpush3.bf16.msra.mxu1 %v2020_v4  ;;  %1724 = vmatpush3.bf16.msra.mxu0 %v2133_v37 }
 0x3de   :  { %1705 = vmatprep.subr.bf16.mxu1 %v1957_v0  ;;  %1725 = vmatprep.subr.bf16.mxu0 %v1957_v0 }
 0x3e1   :  { %1706 = vmatpush3.bf16.msra.mxu1 %v2032_v7  ;;  %1726 = vmatpush3.bf16.msra.mxu0 %v2144_v39 }
 0x3e2   :  { %1707 = vmatprep.subr.bf16.mxu1 %v1957_v0  ;;  %1727 = vmatprep.subr.bf16.mxu0 %v1957_v0 }
 0x3e5   :  { %1708 = vmatpush3.bf16.msra.mxu1 %v2053_v14  ;;  %1728 = vmatpush3.bf16.msra.mxu0 %v2158_v41 }
 0x3e6   :  { %1709 = vmatprep.subr.bf16.mxu1 %v1957_v0  ;;  %1729 = vmatprep.subr.bf16.mxu0 %v1957_v0 }
 0x3e9   :  { %1710 = vmatpush3.bf16.msra.mxu1 %v2067_v18  ;;  %1730 = vmatpush3.bf16.msra.mxu0 %v2172_v43 }
 0x3ea   :  { %1711 = vmatprep.subr.bf16.mxu1 %v1957_v0  ;;  %1731 = vmatprep.subr.bf16.mxu0 %v1957_v0 }
 0x3ed   :  { %1712 = vmatpush3.bf16.msra.mxu1 %v2081_v22  ;;  %1732 = vmatpush3.bf16.msra.mxu0 %v2186_v45 }
 0x3ee   :  { %1713 = vmatprep.subr.bf16.mxu1 %v1957_v0  ;;  %1733 = vmatprep.subr.bf16.mxu0 %v1957_v0 }
 0x3f1   :  { %1714 = vmatpush3.bf16.msra.mxu1 %v2095_v26  ;;  %1734 = vmatpush3.bf16.msra.mxu0 %v2200_v47 }
 0x3f2   :  { %1739 = vmatprep.subr.bf16.mxu1 %v1957_v0  ;;  %1759 = vmatprep.subr.bf16.mxu0 %v1957_v0 }
 0x4a7   :  { %v679_v56 = vpop.f32.mrb[12].mxu1  ;;  %v719_v17 = vpop.f32.mrb[32].mxu0 }
 0x4a8   :  { %v720_v19 = vadd.f32 %v719_v17, %v679_v56  ;;  %v1677_v21 = vpop.f32.mrb[13].mxu1  ;;  %v1697_v23 = vpop.f32.mrb[33].mxu0 }
 0x4a9   :  { %v682_v25 = vpop.f32.mrb[14].mxu1  ;;  %v722_v27 = vpop.f32.mrb[34].mxu0 }
 0x4aa   :  { %v726_v28 = vadd.f32 %v725_v20, %v720_v19  ;;  %v1678_v29 = vpop.f32.mrb[15].mxu1  ;;  %v1698_v32 = vpop.f32.mrb[35].mxu0 }
 0x4ac   :  { %v727_v33 = vadd.f32 %v726_v28, %v2249_v58 }
 0x4ae   :  { %v2459_v36 = vsub.f32 %v727_v33, %v728_v34 }
 0x4b0   :  { %vm730_vm9 = vcmp.gt.f32.partialorder %v2459_v36, 0.5 }
 0x4b1   :  { %vm1232_vm10 = vmpackc.low %vm730_vm9, %vm730_vm9 }
 0x4b2   :  { %1716 = vmatmul.mubr.msk.bf16.vlgmr.msra.gmra.mrb[16].mxu1 %vm1232_vm10, %v1961_v9  ;;  %1736 = vmatmul.mubr.msk.bf16.vlgmr.msra.gmra.mrb[36].mxu0 %vm1232_vm10, %v1961_v9 }
 0x4b3   :  { %1740 = vmatpush3.bf16.msra.mxu1 %v2002_v1  ;;  %1760 = vmatpush3.bf16.msra.mxu0 %v2109_v30  ;;  %v924_v1 = vld [vmem:[%s2633_s4] sm:$0xff] }
 0x4b4   :  { %1741 = vmatprep.subr.bf16.mxu1 %v1957_v0  ;;  %1761 = vmatprep.subr.bf16.mxu0 %v1957_v0 }
 0x4b5   :  { %1755 = vmatprep.mubr.msk.bf16.mxu1 %vm1959_vm0, %v1957_v0  ;;  %1775 = vmatprep.mubr.msk.bf16.mxu0 %vm1959_vm0, %v1957_v0 }
 0x4b7   :  { %1742 = vmatpush3.bf16.msra.mxu1 %v2013_v3  ;;  %1762 = vmatpush3.bf16.msra.mxu0 %v2123_v35  ;;  %v925_v3 = vld [vmem:[%s2633_s4 + $0x8] sm:$0xff] }
 0x4b8   :  { %1743 = vmatprep.subr.bf16.mxu1 %v1957_v0  ;;  %1763 = vmatprep.subr.bf16.mxu0 %v1957_v0 }
 0x4bb   :  { %1744 = vmatpush3.bf16.msra.mxu1 %v2020_v4  ;;  %1764 = vmatpush3.bf16.msra.mxu0 %v2133_v37  ;;  %v1875_v4 = vpack.c.bf16 %v925_v3, %v924_v1  ;;  %v1045_v1 = vld [vmem:[%s2634_s5] sm:$0xff] }
 0x4bc   :  { %1745 = vmatprep.subr.bf16.mxu1 %v1957_v0  ;;  %1765 = vmatprep.subr.bf16.mxu0 %v1957_v0  ;;  %v1049_v3 = vld [vmem:[%s2634_s5 + $0x20] sm:$0xff] }
 0x4bf   :  { %1746 = vmatpush3.bf16.msra.mxu1 %v2032_v7  ;;  %1766 = vmatpush3.bf16.msra.mxu0 %v2144_v39 }
 0x4c0   :  { %1747 = vmatprep.subr.bf16.mxu1 %v1957_v0  ;;  %1767 = vmatprep.subr.bf16.mxu0 %v1957_v0 }
 0x4c3   :  { %1748 = vmatpush3.bf16.msra.mxu1 %v2053_v14  ;;  %1768 = vmatpush3.bf16.msra.mxu0 %v2158_v41 }
 0x4c4   :  { %1749 = vmatprep.subr.bf16.mxu1 %v1957_v0  ;;  %1769 = vmatprep.subr.bf16.mxu0 %v1957_v0 }
 0x4c7   :  { %1750 = vmatpush3.bf16.msra.mxu1 %v2067_v18  ;;  %1770 = vmatpush3.bf16.msra.mxu0 %v2172_v43 }
 0x4c8   :  { %1751 = vmatprep.subr.bf16.mxu1 %v1957_v0  ;;  %1771 = vmatprep.subr.bf16.mxu0 %v1957_v0 }
 0x4cb   :  { %1752 = vmatpush3.bf16.msra.mxu1 %v2081_v22  ;;  %1772 = vmatpush3.bf16.msra.mxu0 %v2186_v45  ;;  %v816_v22 = vmul.f32 0.95122945, %v2459_v36 }
 0x4cc   :  { %1753 = vmatprep.subr.bf16.mxu1 %v1957_v0  ;;  %1773 = vmatprep.subr.bf16.mxu0 %v1957_v0 }
 0x4cf   :  { %1754 = vmatpush3.bf16.msra.mxu1 %v2095_v26  ;;  %1774 = vmatpush3.bf16.msra.mxu0 %v2200_v47  ;;  %v1231_v26 = vsel %vm730_vm9, 1.0, %v1957_v0 }
 0x4d0   :  { %1876 = vmatprep.subr.bf16.mxu1 %v1875_v4  ;;  %v819_v58 = vmul.f32 0.5, %v1231_v26  ;;  %v1048_v26 = vld [vmem:[%s2634_s5 + $0x18] sm:$0xff] }
 0x585   :  { %v770_v7 = vpop.f32.mrb[16].mxu1  ;;  %v810_v14 = vpop.f32.mrb[36].mxu0 }
 0x586   :  { %v811_v18 = vadd.f32 %v810_v14, %v770_v7  ;;  %v1717_v30 = vpop.f32.mrb[17].mxu1  ;;  %v1737_v35 = vpop.f32.mrb[37].mxu0 }
 0x587   :  { %v773_v37 = vpop.f32.mrb[18].mxu1  ;;  %v813_v39 = vpop.f32.mrb[38].mxu0  ;;  %v1047_v30 = vld [vmem:[%s2634_s5 + $0x10] sm:$0xff] }
 0x588   :  { %v817_v41 = vadd.f32 %v816_v22, %v811_v18  ;;  %v1718_v43 = vpop.f32.mrb[19].mxu1  ;;  %v1738_v45 = vpop.f32.mrb[39].mxu0  ;;  %v1046_v18 = vld [vmem:[%s2634_s5 + $0x8] sm:$0xff]  ;;  %v1051_v35 = vld [vmem:[%s2634_s5 + $0x30] sm:$0xff]  ;;  %v1052_v37 = vld [vmem:[%s2634_s5 + $0x38] sm:$0xff] }
 0x589   :  { %v1050_v22 = vld [vmem:[%s2634_s5 + $0x28] sm:$0xff] }
 0x58a   :  { %v818_v47 = vadd.f32 %v817_v41, %v2251_v60  ;;  %v929_v60 = vld [vmem:[%s2633_s4 + $0x28] sm:$0xff] }
 0x58b   :  { %v1883_v48 = vpack.c.bf16 %v929_v60, %v928_v46 }
 0x58c   :  { %v820_v42 = vsub.f32 %v818_v47, %v819_v58 }
 0x58e   :  { %vm821_vm11 = vcmp.gt.f32.partialorder %v820_v42, 0.5  ;;  %v907_v56 = vmul.f32 0.95122945, %v820_v42 }
 0x58f   :  { %vm1237_vm12 = vmpackc.low %vm821_vm11, %vm821_vm11  ;;  %v1236_v53 = vsel %vm821_vm11, 1.0, %v1957_v0 }
 0x590   :  { %1756 = vmatmul.mubr.msk.bf16.vlgmr.msra.gmra.mrb[20].mxu1 %vm1237_vm12, %v1961_v9  ;;  %1776 = vmatmul.mubr.msk.bf16.vlgmr.msra.gmra.mrb[40].mxu0 %vm1237_vm12, %v1961_v9  ;;  %v932_v9 = vld [vmem:[%s2633_s4 + $0x40] sm:$0xff]  ;;  %v910_v24 = vmul.f32 0.5, %v1236_v53 }
 0x591   :  { %1878 = vmatpush3.bf16.msra.mxu1 %v1875_v4  ;;  %1811 = vmatprep.mubr.f32.mxu1 %v1957_v0  ;;  %v1891_v54 = vpack.c.bf16 %v933_v52, %v932_v9 }
 0x592   :  { %1880 = vmatprep.subr.bf16.mxu1 %v1879_v44  ;;  %1839 = vmatprep.mubr.msk.f32.mxu0 %vm1053_vm14, %v1045_v1 }
 0x595   :  { %1882 = vmatpush3.bf16.msra.mxu1 %v1879_v44 }
 0x596   :  { %1884 = vmatprep.subr.bf16.mxu1 %v1883_v48 }
 0x599   :  { %1886 = vmatpush3.bf16.msra.mxu1 %v1883_v48 }
 0x59a   :  { %1888 = vmatprep.subr.bf16.mxu1 %v1887_v51 }
 0x59d   :  { %1890 = vmatpush3.bf16.msra.mxu1 %v1887_v51 }
 0x59e   :  { %1892 = vmatprep.subr.bf16.mxu1 %v1891_v54 }
 0x5a1   :  { %1894 = vmatpush3.bf16.msra.mxu1 %v1891_v54 }
 0x5a2   :  { %1896 = vmatprep.subr.bf16.mxu1 %v1895_v59 }
 0x5a5   :  { %1898 = vmatpush3.bf16.msra.mxu1 %v1895_v59 }
 0x5a6   :  { %1900 = vmatprep.subr.bf16.mxu1 %v1899_v2 }
 0x5a9   :  { %1902 = vmatpush3.bf16.msra.mxu1 %v1899_v2 }
 0x5aa   :  { %1904 = vmatprep.subr.bf16.mxu1 %v1903_v8 }
 0x5ad   :  { %1906 = vmatpush3.bf16.msra.mxu1 %v1903_v8 }
 0x5b0   :  { %1812 = vmatmul.mubr.msk.f32.vlgmr.msra.gmra.mrb[24].mxu1 %vm366_vm1, %v1962_v11 }
 0x5b1   :  { %1814 = vmatprep.mubr.msk.f32.mxu1 %vm457_vm3, %v1962_v11 }
 0x5b4   :  { %1815 = vmatmul.mubr.msk.f32.gmra.mrb[26].mxu1 %vm548_vm5, %v1962_v11 }
 0x5b5   :  { %1817 = vmatprep.mubr.msk.f32.mxu1 %vm639_vm7, %v1962_v11 }
 0x5b8   :  { %1818 = vmatmul.mubr.msk.f32.gmra.mrb[28].mxu1 %vm730_vm9, %v1962_v11 }
 0x5b9   :  { %1820 = vmatprep.mubr.msk.f32.mxu1 %vm821_vm11, %v1962_v11 }
 0x663   :  { %v861_v12 = vpop.f32.mrb[20].mxu1  ;;  %v901_v13 = vpop.f32.mrb[40].mxu0 }
 0x664   :  { %v902_v15 = vadd.f32 %v901_v13, %v861_v12  ;;  %v1757_v63 = vpop.f32.mrb[21].mxu1  ;;  %v1777_v17 = vpop.f32.mrb[41].mxu0 }
 0x665   :  { %v864_v19 = vpop.f32.mrb[22].mxu1  ;;  %v904_v31 = vpop.f32.mrb[42].mxu0 }
 0x666   :  { %v908_v20 = vadd.f32 %v907_v56, %v902_v15  ;;  %v1758_v21 = vpop.f32.mrb[23].mxu1  ;;  %v1778_v16 = vpop.f32.mrb[43].mxu0 }
 0x668   :  { %v909_v23 = vadd.f32 %v908_v20, %v2301_v10 }
 0x66a   :  { %v911_v25 = vsub.f32 %v909_v23, %v910_v24 }
 0x66c   :  { %vm912_vm13 = vcmp.gt.f32.partialorder %v911_v25, 0.5 }
 0x66d   :  { %1821 = vmatmul.mubr.msk.f32.gmra.mrb[30].mxu1 %vm912_vm13, %v1962_v11 }
 0x66e   :  { %1845 = vmatprep.mubr.msk.f32.mxu1 %vm1053_vm14, %v1049_v3 }
 0x683   :  { %v1813_v27 = vpop.f32.mrb[24].mxu1 }
 0x684   :  { %v1006_v28 = vpop.f32.mrb[25].mxu1 }
 0x685   :  { %v1907_v29 = vpack.c.bf16 %v1813_v27, %v1006_v28 }
 0x687   :  { %v1816_v32 = vpop.f32.mrb[26].mxu1  ;;  %1908 = vmatprep.subr.bf16.mxu0 %v1907_v29  ;;  %1923 = vmatprep.subr.bf16.mxu1 %v1907_v29 }
 0x688   :  { %v1016_v33 = vpop.f32.mrb[27].mxu1  ;;  %1910 = vmatpush3.bf16.msra.mxu0 %v1907_v29  ;;  %1927 = vmatpush3.bf16.msra.mxu1 %v1907_v29 }
 0x689   :  { %v1911_v34 = vpack.c.bf16 %v1816_v32, %v1016_v33 }
 0x68b   :  { %v1819_v0 = vpop.f32.mrb[28].mxu1  ;;  %1912 = vmatprep.subr.bf16.mxu0 %v1911_v34  ;;  %1924 = vmatprep.subr.bf16.mxu1 %v1911_v34 }
 0x68c   :  { %v1026_v36 = vpop.f32.mrb[29].mxu1  ;;  %1914 = vmatpush3.bf16.msra.mxu0 %v1911_v34  ;;  %1928 = vmatpush3.bf16.msra.mxu1 %v1911_v34 }
 0x68d   :  { %v1915_v10 = vpack.c.bf16 %v1819_v0, %v1026_v36 }
 0x68f   :  { %1916 = vmatprep.subr.bf16.mxu0 %v1915_v10  ;;  %1925 = vmatprep.subr.bf16.mxu1 %v1915_v10 }
 0x690   :  { %1918 = vmatpush3.bf16.msra.mxu0 %v1915_v10  ;;  %1929 = vmatpush3.bf16.msra.mxu1 %v1915_v10 }
 0x740   :  { %v1822_v4 = vpop.f32.mrb[30].mxu1 }
 0x741   :  { %v1036_v7 = vpop.f32.mrb[31].mxu1 }
 0x742   :  { %v1919_v14 = vpack.c.bf16 %v1822_v4, %v1036_v7 }
 0x744   :  { %1920 = vmatprep.subr.bf16.mxu0 %v1919_v14  ;;  %1926 = vmatprep.subr.bf16.mxu1 %v1919_v14 }
 0x745   :  { %1922 = vmatpush3.bf16.msra.mxu0 %v1919_v14  ;;  %1930 = vmatpush3.bf16.msra.mxu1 %v1919_v14 }
 0x748   :  { %1840 = vmatmul.mubr.msk.f32.vlgmr.msra.gmra.mrb[14].mxu0 %vm1053_vm14, %v1046_v18  ;;  %1846 = vmatmul.mubr.msk.f32.vlgmr.msra.gmra.mrb[32].mxu1 %vm1053_vm14, %v1050_v22 }
 0x749   :  { %1842 = vmatprep.mubr.msk.f32.mxu0 %vm1053_vm14, %v1047_v30  ;;  %1848 = vmatprep.mubr.msk.f32.mxu1 %vm1053_vm14, %v1051_v35 }
 0x74c   :  { %1843 = vmatmul.mubr.msk.f32.gmra.mrb[44].mxu0 %vm1053_vm14, %v1048_v26  ;;  %1849 = vmatmul.mubr.msk.f32.gmra.mrb[34].mxu1 %vm1053_vm14, %v1052_v37 }
 0x81b   :  { %v1841_v39 = vpop.f32.mrb[14].mxu0  ;;  %v1847_v41 = vpop.f32.mrb[32].mxu1 }
 0x81c   :  { %1184 = vst [vmem:[%s2635_s6 + $0x8] sm:$0xff] %v1841_v39  ;;  %1188 = vst [vmem:[%s2635_s6 + $0x28] sm:$0xff] %v1847_v41  ;;  %v1144_v43 = vpop.f32.mrb[15].mxu0  ;;  %v1164_v45 = vpop.f32.mrb[33].mxu1 }
 0x81d   :  { %1183 = vst [vmem:[%s2635_s6] sm:$0xff] %v1144_v43  ;;  %1187 = vst [vmem:[%s2635_s6 + $0x20] sm:$0xff] %v1164_v45 }
 0x81f   :  { %v1844_v47 = vpop.f32.mrb[44].mxu0  ;;  %v1850_v58 = vpop.f32.mrb[34].mxu1 }
 0x820   :  { %1186 = vst [vmem:[%s2635_s6 + $0x18] sm:$0xff] %v1844_v47  ;;  %1190 = vst [vmem:[%s2635_s6 + $0x38] sm:$0xff] %v1850_v58  ;;  %v1154_v38 = vpop.f32.mrb[45].mxu0  ;;  %v1174_v40 = vpop.f32.mrb[35].mxu1 }
 0x821   :  { %1185 = vst [vmem:[%s2635_s6 + $0x10] sm:$0xff] %v1154_v38  ;;  %1189 = vst [vmem:[%s2635_s6 + $0x30] sm:$0xff] %v1174_v40 }

</bundles_post_ra>
